<compile_context>
chip_gen: v7x
topology: tpu7x:2x2x1
jax: 0.10.0
libtpu: 0.0.40
codegen_flags: <defaults>
</compile_context>

<pallas_src>
import functools

import jax
import jax.numpy as jnp
import numpy as np
from jax.experimental import pallas as pl
from jax.experimental.pallas import tpu as pltpu


def _round_up(v: int, m: int) -> int:
    return ((v + m - 1) // m) * m


def _rnn_fc_kernel(x_ref, w_ih_ref, w_hh_ref, b_ref, w_fc_ref, b_fc_ref,
                   y_ref, hsave_ref, *, Bp, T, Ip, Hp):
    """Whole model, one invocation.  All refs are whole-array VMEM blocks padded
    to (8,128)-aligned tiles, except b_fc_ref which is a scalar in SMEM.

      x_ref     : (Bp, T*Ip)  batch-major; cols [t*Ip:(t+1)*Ip] hold padded x_t
      w_ih_ref  : (Ip, Hp)    W_ih^T, zero padded
      w_hh_ref  : (Hp, Hp)    W_hh^T, zero padded
      b_ref     : (1, Hp)     b_ih + b_hh, zero padded
      w_fc_ref  : (1, Hp)     fc weight row, zero padded
      b_fc_ref  : (1,)        fc bias scalar (SMEM)
      y_ref     : (Bp, YL)    sigmoid(fc(h_t)) at [b, t]; lanes >= T unused
      hsave_ref : (Bp, T*Hp)  h_t at cols [t*Hp:(t+1)*Hp]  (RNN output sequence)
    """
    f32 = jnp.float32

    # ---- (1) hoisted input projection for all T steps, kept in registers ---
    # T independent (Bp,Ip)@(Ip,Hp) matmuls; none depend on h, so they pipeline
    # back-to-back on the MXU before the serial recurrence starts.
    w_ih = w_ih_ref[...]
    bias = jnp.broadcast_to(b_ref[...], (Bp, Hp))          # hoisted broadcast
    pre = [
        jnp.dot(x_ref[:, t * Ip:(t + 1) * Ip], w_ih,
                preferred_element_type=f32) + bias
        for t in range(T)
    ]

    # ---- (2) serial recurrence over T, fully unrolled (T static & small) ---
    w_hh = w_hh_ref[...]                                   # loop-invariant RHS
    h = jnp.zeros((Bp, Hp), f32)                           # h0 = 0, as in module
    hs = []
    for t in range(T):
        h = jnp.tanh(pre[t]
                     + jnp.dot(h, w_hh, preferred_element_type=f32))
        hs.append(h)
        hsave_ref[:, t * Hp:(t + 1) * Hp] = h              # aligned (8,128) store

    # ---- (3) fc + sigmoid epilogue, hoisted out of the loop ----------------
    YL = y_ref.shape[1]
    w_fc = jnp.broadcast_to(w_fc_ref[...], (Bp, Hp))       # hoisted broadcast
    b_fc = b_fc_ref[0]
    lane = jax.lax.broadcasted_iota(jnp.int32, (Bp, YL), 1)
    logits = jnp.zeros((Bp, YL), f32)
    for t in range(T):
        col = jnp.sum(hs[t] * w_fc, axis=1, keepdims=True) + b_fc   # (Bp, 1)
        logits = jnp.where(lane == t, col, logits)         # pack t along lanes
    y_ref[...] = jax.nn.sigmoid(logits)                    # one unmasked store


@jax.jit
def model_forward(x, w_ih, w_hh, b_ih, b_hh, w_fc, b_fc):
    """x: (B, T, I) float32, batch_first.  Returns (sigmoid(fc(rnn_out)), rnn_out)."""
    B, T, I = x.shape
    H = w_hh.shape[0]

    Bp = _round_up(B, 8)       # sublane tile
    Hp = _round_up(H, 128)     # lane tile
    Ip = _round_up(I, 128)     # lane tile (contraction dim)
    YL = _round_up(T, 128)     # lane-dense y slab width

    # Zero padding is numerically exact: padded input lanes / weight rows &
    # cols / bias lanes are zero, so real lanes of h never see pad data, and
    # padded batch rows are independent garbage that is sliced off below.
    x_p = jnp.pad(x.astype(jnp.float32),
                  ((0, Bp - B), (0, 0), (0, Ip - I)))
    x_in = x_p.reshape(Bp, T * Ip)                          # batch-major slab

    w_ih_t = jnp.pad(w_ih.T, ((0, Ip - I), (0, Hp - H)))    # (Ip, Hp)
    w_hh_t = jnp.pad(w_hh.T, ((0, Hp - H), (0, Hp - H)))    # (Hp, Hp)
    b = jnp.pad(b_ih + b_hh, (0, Hp - H)).reshape(1, Hp)    # combined RNN bias
    w_fc_row = jnp.pad(w_fc.reshape(1, H), ((0, 0), (0, Hp - H)))
    b_fc_s = b_fc.reshape(1)                                # scalar -> SMEM

    kernel = functools.partial(_rnn_fc_kernel, Bp=Bp, T=T, Ip=Ip, Hp=Hp)

    y_slab, hsave_slab = pl.pallas_call(
        kernel,
        out_shape=(
            jax.ShapeDtypeStruct((Bp, YL), jnp.float32),      # sigmoid(fc(h)) [b, t]
            jax.ShapeDtypeStruct((Bp, T * Hp), jnp.float32),  # rnn hidden states
        ),
        in_specs=[
            pl.BlockSpec(memory_space=pltpu.MemorySpace.VMEM),   # x slab
            pl.BlockSpec(memory_space=pltpu.MemorySpace.VMEM),   # W_ih^T
            pl.BlockSpec(memory_space=pltpu.MemorySpace.VMEM),   # W_hh^T
            pl.BlockSpec(memory_space=pltpu.MemorySpace.VMEM),   # b_ih + b_hh
            pl.BlockSpec(memory_space=pltpu.MemorySpace.VMEM),   # W_fc row
            pl.BlockSpec(memory_space=pltpu.MemorySpace.SMEM),   # b_fc scalar
        ],
        out_specs=(
            pl.BlockSpec(memory_space=pltpu.MemorySpace.VMEM),
            pl.BlockSpec(memory_space=pltpu.MemorySpace.VMEM),
        ),
    )(x_in, w_ih_t, w_hh_t, b, w_fc_row, b_fc_s)

    # Outputs are already batch-major: slice the pads off, no transposes.
    y = y_slab[:B, :T][:, :, None]                           # (B, T, 1)
    x_save = hsave_slab.reshape(Bp, T, Hp)[:B, :, :H]        # (B, T, H)
    return y, x_save


def reference_forward(x, w_ih, w_hh, b_ih, b_hh, w_fc, b_fc):
    """Pure-JAX reference mirroring torch.nn.RNN(batch_first=True) + Linear + sigmoid."""
    B, T, _ = x.shape
    H = w_hh.shape[0]
    h = jnp.zeros((B, H), jnp.float32)
    hs, ys = [], []
    for t in range(T):
        h = jnp.tanh(x[:, t] @ w_ih.T + b_ih + h @ w_hh.T + b_hh)
        hs.append(h)
        ys.append(jax.nn.sigmoid(h @ w_fc.T + b_fc))
    return jnp.stack(ys, axis=1), jnp.stack(hs, axis=1)


if __name__ == "__main__":
    B, T, I, H = 2, 8, 32, 64  # batch, seq, input_size (= input_shape), hidden

    key = jax.random.PRNGKey(0)
    kx, k1, k2, k3, k4, k5, k6 = jax.random.split(key, 7)

    x = jax.random.normal(kx, (B, T, I), dtype=jnp.float32)

    # NOTE: the original module zero-fills the RNN weights/biases in __init__;
    # we use small non-zero values so the recurrence is actually exercised.
    # The forward-pass math is identical either way.
    w_ih = 0.1 * jax.random.normal(k1, (H, I), dtype=jnp.float32)   # rnn.weight_ih_l0
    w_hh = 0.1 * jax.random.normal(k2, (H, H), dtype=jnp.float32)   # rnn.weight_hh_l0
    b_ih = 0.1 * jax.random.normal(k3, (H,), dtype=jnp.float32)     # rnn.bias_ih_l0
    b_hh = 0.1 * jax.random.normal(k4, (H,), dtype=jnp.float32)     # rnn.bias_hh_l0
    w_fc = 0.1 * jax.random.normal(k5, (1, H), dtype=jnp.float32)   # fc.weight
    b_fc = 0.1 * jax.random.normal(k6, (1,), dtype=jnp.float32)     # fc.bias

    y, x_save = model_forward(x, w_ih, w_hh, b_ih, b_hh, w_fc, b_fc)
    jax.block_until_ready((y, x_save))

    y_ref, x_save_ref = reference_forward(x, w_ih, w_hh, b_ih, b_hh, w_fc, b_fc)
    np.testing.assert_allclose(np.asarray(y), np.asarray(y_ref), rtol=1e-5, atol=1e-5)
    np.testing.assert_allclose(np.asarray(x_save), np.asarray(x_save_ref),
                               rtol=1e-5, atol=1e-5)
    assert y.shape == (B, T, 1) and x_save.shape == (B, T, H)

    print("KERNEL_OK")
</pallas_src>

<mosaic_0001>
module attributes {stable_mosaic.version = 11 : i64} {
  func.func @_rnn_fc_kernel(%arg0: memref<8x1024xf32, #tpu.memory_space<vmem>>, %arg1: memref<128x128xf32, #tpu.memory_space<vmem>>, %arg2: memref<128x128xf32, #tpu.memory_space<vmem>>, %arg3: memref<1x128xf32, #tpu.memory_space<vmem>>, %arg4: memref<1x128xf32, #tpu.memory_space<vmem>>, %arg5: memref<1xf32, #tpu.memory_space<smem>>, %arg6: memref<8x128xf32, #tpu.memory_space<vmem>>, %arg7: memref<8x1024xf32, #tpu.memory_space<vmem>>) attributes {dimension_semantics = [], scalar_prefetch = 0 : i64, scratch_operands = 0 : i64, tpu.core_type = #tpu.core_type<tc>} {
    %c0 = arith.constant 0 : index
    %c0_0 = arith.constant 0 : index
    %0 = vector.load %arg1[%c0, %c0_0] : memref<128x128xf32, #tpu.memory_space<vmem>>, vector<128x128xf32>
    %c0_1 = arith.constant 0 : index
    %c0_2 = arith.constant 0 : index
    %1 = vector.load %arg3[%c0_1, %c0_2] : memref<1x128xf32, #tpu.memory_space<vmem>>, vector<1x128xf32>
    %2 = vector.shape_cast %1 : vector<1x128xf32> to vector<1x128xf32>
    %3 = vector.broadcast %2 : vector<1x128xf32> to vector<8x128xf32>
    %c0_3 = arith.constant 0 : index
    %c0_4 = arith.constant 0 : index
    %4 = vector.load %arg0[%c0_3, %c0_4] : memref<8x1024xf32, #tpu.memory_space<vmem>>, vector<8x128xf32>
    %cst = arith.constant dense<0.000000e+00> : vector<8x128xf32>
    %5 = tpu.matmul %4, %0, %cst {dimension_numbers = #tpu.dot_dimension_numbers<[1], [0], [0], [1], [0, 0, 1, 1], [], []>} : vector<8x128xf32>, vector<128x128xf32>, vector<8x128xf32> -> vector<8x128xf32>
    %6 = arith.addf %5, %3 : vector<8x128xf32>
    %c0_5 = arith.constant 0 : index
    %c128 = arith.constant 128 : index
    %7 = vector.load %arg0[%c0_5, %c128] : memref<8x1024xf32, #tpu.memory_space<vmem>>, vector<8x128xf32>
    %cst_6 = arith.constant dense<0.000000e+00> : vector<8x128xf32>
    %8 = tpu.matmul %7, %0, %cst_6 {dimension_numbers = #tpu.dot_dimension_numbers<[1], [0], [0], [1], [0, 0, 1, 1], [], []>} : vector<8x128xf32>, vector<128x128xf32>, vector<8x128xf32> -> vector<8x128xf32>
    %9 = arith.addf %8, %3 : vector<8x128xf32>
    %c0_7 = arith.constant 0 : index
    %c256 = arith.constant 256 : index
    %10 = vector.load %arg0[%c0_7, %c256] : memref<8x1024xf32, #tpu.memory_space<vmem>>, vector<8x128xf32>
    %cst_8 = arith.constant dense<0.000000e+00> : vector<8x128xf32>
    %11 = tpu.matmul %10, %0, %cst_8 {dimension_numbers = #tpu.dot_dimension_numbers<[1], [0], [0], [1], [0, 0, 1, 1], [], []>} : vector<8x128xf32>, vector<128x128xf32>, vector<8x128xf32> -> vector<8x128xf32>
    %12 = arith.addf %11, %3 : vector<8x128xf32>
    %c0_9 = arith.constant 0 : index
    %c384 = arith.constant 384 : index
    %13 = vector.load %arg0[%c0_9, %c384] : memref<8x1024xf32, #tpu.memory_space<vmem>>, vector<8x128xf32>
    %cst_10 = arith.constant dense<0.000000e+00> : vector<8x128xf32>
    %14 = tpu.matmul %13, %0, %cst_10 {dimension_numbers = #tpu.dot_dimension_numbers<[1], [0], [0], [1], [0, 0, 1, 1], [], []>} : vector<8x128xf32>, vector<128x128xf32>, vector<8x128xf32> -> vector<8x128xf32>
    %15 = arith.addf %14, %3 : vector<8x128xf32>
    %c0_11 = arith.constant 0 : index
    %c512 = arith.constant 512 : index
    %16 = vector.load %arg0[%c0_11, %c512] : memref<8x1024xf32, #tpu.memory_space<vmem>>, vector<8x128xf32>
    %cst_12 = arith.constant dense<0.000000e+00> : vector<8x128xf32>
    %17 = tpu.matmul %16, %0, %cst_12 {dimension_numbers = #tpu.dot_dimension_numbers<[1], [0], [0], [1], [0, 0, 1, 1], [], []>} : vector<8x128xf32>, vector<128x128xf32>, vector<8x128xf32> -> vector<8x128xf32>
    %18 = arith.addf %17, %3 : vector<8x128xf32>
    %c0_13 = arith.constant 0 : index
    %c640 = arith.constant 640 : index
    %19 = vector.load %arg0[%c0_13, %c640] : memref<8x1024xf32, #tpu.memory_space<vmem>>, vector<8x128xf32>
    %cst_14 = arith.constant dense<0.000000e+00> : vector<8x128xf32>
    %20 = tpu.matmul %19, %0, %cst_14 {dimension_numbers = #tpu.dot_dimension_numbers<[1], [0], [0], [1], [0, 0, 1, 1], [], []>} : vector<8x128xf32>, vector<128x128xf32>, vector<8x128xf32> -> vector<8x128xf32>
    %21 = arith.addf %20, %3 : vector<8x128xf32>
    %c0_15 = arith.constant 0 : index
    %c768 = arith.constant 768 : index
    %22 = vector.load %arg0[%c0_15, %c768] : memref<8x1024xf32, #tpu.memory_space<vmem>>, vector<8x128xf32>
    %cst_16 = arith.constant dense<0.000000e+00> : vector<8x128xf32>
    %23 = tpu.matmul %22, %0, %cst_16 {dimension_numbers = #tpu.dot_dimension_numbers<[1], [0], [0], [1], [0, 0, 1, 1], [], []>} : vector<8x128xf32>, vector<128x128xf32>, vector<8x128xf32> -> vector<8x128xf32>
    %24 = arith.addf %23, %3 : vector<8x128xf32>
    %c0_17 = arith.constant 0 : index
    %c896 = arith.constant 896 : index
    %25 = vector.load %arg0[%c0_17, %c896] : memref<8x1024xf32, #tpu.memory_space<vmem>>, vector<8x128xf32>
    %cst_18 = arith.constant dense<0.000000e+00> : vector<8x128xf32>
    %26 = tpu.matmul %25, %0, %cst_18 {dimension_numbers = #tpu.dot_dimension_numbers<[1], [0], [0], [1], [0, 0, 1, 1], [], []>} : vector<8x128xf32>, vector<128x128xf32>, vector<8x128xf32> -> vector<8x128xf32>
    %27 = arith.addf %26, %3 : vector<8x128xf32>
    %c0_19 = arith.constant 0 : index
    %c0_20 = arith.constant 0 : index
    %28 = vector.load %arg2[%c0_19, %c0_20] : memref<128x128xf32, #tpu.memory_space<vmem>>, vector<128x128xf32>
    %cst_21 = arith.constant 0.000000e+00 : f32
    %29 = vector.broadcast %cst_21 : f32 to vector<8x128xf32>
    %cst_22 = arith.constant dense<0.000000e+00> : vector<8x128xf32>
    %30 = tpu.matmul %29, %28, %cst_22 {dimension_numbers = #tpu.dot_dimension_numbers<[1], [0], [0], [1], [0, 0, 1, 1], [], []>} : vector<8x128xf32>, vector<128x128xf32>, vector<8x128xf32> -> vector<8x128xf32>
    %31 = arith.addf %6, %30 : vector<8x128xf32>
    %32 = math.tanh %31 : vector<8x128xf32>
    %c0_23 = arith.constant 0 : index
    %c0_24 = arith.constant 0 : index
    %33 = vector.load %arg7[%c0_23, %c0_24] : memref<8x1024xf32, #tpu.memory_space<vmem>>, vector<8x128xf32>
    tpu.vector_store %arg7[%c0_23, %c0_24], %32 {strides = array<i32>} : memref<8x1024xf32, #tpu.memory_space<vmem>>, vector<8x128xf32>,
    %cst_25 = arith.constant dense<0.000000e+00> : vector<8x128xf32>
    %34 = tpu.matmul %32, %28, %cst_25 {dimension_numbers = #tpu.dot_dimension_numbers<[1], [0], [0], [1], [0, 0, 1, 1], [], []>} : vector<8x128xf32>, vector<128x128xf32>, vector<8x128xf32> -> vector<8x128xf32>
    %35 = arith.addf %9, %34 : vector<8x128xf32>
    %36 = math.tanh %35 : vector<8x128xf32>
    %c0_26 = arith.constant 0 : index
    %c128_27 = arith.constant 128 : index
    %37 = vector.load %arg7[%c0_26, %c128_27] : memref<8x1024xf32, #tpu.memory_space<vmem>>, vector<8x128xf32>
    tpu.vector_store %arg7[%c0_26, %c128_27], %36 {strides = array<i32>} : memref<8x1024xf32, #tpu.memory_space<vmem>>, vector<8x128xf32>,
    %cst_28 = arith.constant dense<0.000000e+00> : vector<8x128xf32>
    %38 = tpu.matmul %36, %28, %cst_28 {dimension_numbers = #tpu.dot_dimension_numbers<[1], [0], [0], [1], [0, 0, 1, 1], [], []>} : vector<8x128xf32>, vector<128x128xf32>, vector<8x128xf32> -> vector<8x128xf32>
    %39 = arith.addf %12, %38 : vector<8x128xf32>
    %40 = math.tanh %39 : vector<8x128xf32>
    %c0_29 = arith.constant 0 : index
    %c256_30 = arith.constant 256 : index
    %41 = vector.load %arg7[%c0_29, %c256_30] : memref<8x1024xf32, #tpu.memory_space<vmem>>, vector<8x128xf32>
    tpu.vector_store %arg7[%c0_29, %c256_30], %40 {strides = array<i32>} : memref<8x1024xf32, #tpu.memory_space<vmem>>, vector<8x128xf32>,
    %cst_31 = arith.constant dense<0.000000e+00> : vector<8x128xf32>
    %42 = tpu.matmul %40, %28, %cst_31 {dimension_numbers = #tpu.dot_dimension_numbers<[1], [0], [0], [1], [0, 0, 1, 1], [], []>} : vector<8x128xf32>, vector<128x128xf32>, vector<8x128xf32> -> vector<8x128xf32>
    %43 = arith.addf %15, %42 : vector<8x128xf32>
    %44 = math.tanh %43 : vector<8x128xf32>
    %c0_32 = arith.constant 0 : index
    %c384_33 = arith.constant 384 : index
    %45 = vector.load %arg7[%c0_32, %c384_33] : memref<8x1024xf32, #tpu.memory_space<vmem>>, vector<8x128xf32>
    tpu.vector_store %arg7[%c0_32, %c384_33], %44 {strides = array<i32>} : memref<8x1024xf32, #tpu.memory_space<vmem>>, vector<8x128xf32>,
    %cst_34 = arith.constant dense<0.000000e+00> : vector<8x128xf32>
    %46 = tpu.matmul %44, %28, %cst_34 {dimension_numbers = #tpu.dot_dimension_numbers<[1], [0], [0], [1], [0, 0, 1, 1], [], []>} : vector<8x128xf32>, vector<128x128xf32>, vector<8x128xf32> -> vector<8x128xf32>
    %47 = arith.addf %18, %46 : vector<8x128xf32>
    %48 = math.tanh %47 : vector<8x128xf32>
    %c0_35 = arith.constant 0 : index
    %c512_36 = arith.constant 512 : index
    %49 = vector.load %arg7[%c0_35, %c512_36] : memref<8x1024xf32, #tpu.memory_space<vmem>>, vector<8x128xf32>
    tpu.vector_store %arg7[%c0_35, %c512_36], %48 {strides = array<i32>} : memref<8x1024xf32, #tpu.memory_space<vmem>>, vector<8x128xf32>,
    %cst_37 = arith.constant dense<0.000000e+00> : vector<8x128xf32>
    %50 = tpu.matmul %48, %28, %cst_37 {dimension_numbers = #tpu.dot_dimension_numbers<[1], [0], [0], [1], [0, 0, 1, 1], [], []>} : vector<8x128xf32>, vector<128x128xf32>, vector<8x128xf32> -> vector<8x128xf32>
    %51 = arith.addf %21, %50 : vector<8x128xf32>
    %52 = math.tanh %51 : vector<8x128xf32>
    %c0_38 = arith.constant 0 : index
    %c640_39 = arith.constant 640 : index
    %53 = vector.load %arg7[%c0_38, %c640_39] : memref<8x1024xf32, #tpu.memory_space<vmem>>, vector<8x128xf32>
    tpu.vector_store %arg7[%c0_38, %c640_39], %52 {strides = array<i32>} : memref<8x1024xf32, #tpu.memory_space<vmem>>, vector<8x128xf32>,
    %cst_40 = arith.constant dense<0.000000e+00> : vector<8x128xf32>
    %54 = tpu.matmul %52, %28, %cst_40 {dimension_numbers = #tpu.dot_dimension_numbers<[1], [0], [0], [1], [0, 0, 1, 1], [], []>} : vector<8x128xf32>, vector<128x128xf32>, vector<8x128xf32> -> vector<8x128xf32>
    %55 = arith.addf %24, %54 : vector<8x128xf32>
    %56 = math.tanh %55 : vector<8x128xf32>
    %c0_41 = arith.constant 0 : index
    %c768_42 = arith.constant 768 : index
    %57 = vector.load %arg7[%c0_41, %c768_42] : memref<8x1024xf32, #tpu.memory_space<vmem>>, vector<8x128xf32>
    tpu.vector_store %arg7[%c0_41, %c768_42], %56 {strides = array<i32>} : memref<8x1024xf32, #tpu.memory_space<vmem>>, vector<8x128xf32>,
    %cst_43 = arith.constant dense<0.000000e+00> : vector<8x128xf32>
    %58 = tpu.matmul %56, %28, %cst_43 {dimension_numbers = #tpu.dot_dimension_numbers<[1], [0], [0], [1], [0, 0, 1, 1], [], []>} : vector<8x128xf32>, vector<128x128xf32>, vector<8x128xf32> -> vector<8x128xf32>
    %59 = arith.addf %27, %58 : vector<8x128xf32>
    %60 = math.tanh %59 : vector<8x128xf32>
    %c0_44 = arith.constant 0 : index
    %c896_45 = arith.constant 896 : index
    %61 = vector.load %arg7[%c0_44, %c896_45] : memref<8x1024xf32, #tpu.memory_space<vmem>>, vector<8x128xf32>
    tpu.vector_store %arg7[%c0_44, %c896_45], %60 {strides = array<i32>} : memref<8x1024xf32, #tpu.memory_space<vmem>>, vector<8x128xf32>,
    %c0_46 = arith.constant 0 : index
    %c0_47 = arith.constant 0 : index
    %62 = vector.load %arg4[%c0_46, %c0_47] : memref<1x128xf32, #tpu.memory_space<vmem>>, vector<1x128xf32>
    %63 = vector.shape_cast %62 : vector<1x128xf32> to vector<1x128xf32>
    %64 = vector.broadcast %63 : vector<1x128xf32> to vector<8x128xf32>
    %c0_48 = arith.constant 0 : index
    %65 = memref.load %arg5[%c0_48] : memref<1xf32, #tpu.memory_space<smem>>
    %66 = tpu.iota {dimensions = array<i32: 1>} : vector<8x128xi32>
    %cst_49 = arith.constant 0.000000e+00 : f32
    %67 = vector.broadcast %cst_49 : f32 to vector<8x128xf32>
    %68 = arith.mulf %32, %64 : vector<8x128xf32>
    %cst_50 = arith.constant dense<0.000000e+00> : vector<8xf32>
    %69 = vector.multi_reduction <add>, %68, %cst_50 [1] : vector<8x128xf32> to vector<8xf32>
    %70 = vector.shape_cast %69 : vector<8xf32> to vector<8x1xf32>
    %71 = vector.broadcast %65 : f32 to vector<8x1xf32>
    %72 = arith.addf %70, %71 : vector<8x1xf32>
    %c0_i32 = arith.constant 0 : i32
    %73 = vector.broadcast %c0_i32 : i32 to vector<8x128xi32>
    %74 = arith.cmpi eq, %66, %73 : vector<8x128xi32>
    %75 = vector.shape_cast %72 : vector<8x1xf32> to vector<8x1xf32>
    %76 = vector.broadcast %75 : vector<8x1xf32> to vector<8x128xf32>
    %77 = arith.select %74, %76, %67 : vector<8x128xi1>, vector<8x128xf32>
    %78 = arith.mulf %36, %64 : vector<8x128xf32>
    %cst_51 = arith.constant dense<0.000000e+00> : vector<8xf32>
    %79 = vector.multi_reduction <add>, %78, %cst_51 [1] : vector<8x128xf32> to vector<8xf32>
    %80 = vector.shape_cast %79 : vector<8xf32> to vector<8x1xf32>
    %81 = vector.broadcast %65 : f32 to vector<8x1xf32>
    %82 = arith.addf %80, %81 : vector<8x1xf32>
    %c1_i32 = arith.constant 1 : i32
    %83 = vector.broadcast %c1_i32 : i32 to vector<8x128xi32>
    %84 = arith.cmpi eq, %66, %83 : vector<8x128xi32>
    %85 = vector.shape_cast %82 : vector<8x1xf32> to vector<8x1xf32>
    %86 = vector.broadcast %85 : vector<8x1xf32> to vector<8x128xf32>
    %87 = arith.select %84, %86, %77 : vector<8x128xi1>, vector<8x128xf32>
    %88 = arith.mulf %40, %64 : vector<8x128xf32>
    %cst_52 = arith.constant dense<0.000000e+00> : vector<8xf32>
    %89 = vector.multi_reduction <add>, %88, %cst_52 [1] : vector<8x128xf32> to vector<8xf32>
    %90 = vector.shape_cast %89 : vector<8xf32> to vector<8x1xf32>
    %91 = vector.broadcast %65 : f32 to vector<8x1xf32>
    %92 = arith.addf %90, %91 : vector<8x1xf32>
    %c2_i32 = arith.constant 2 : i32
    %93 = vector.broadcast %c2_i32 : i32 to vector<8x128xi32>
    %94 = arith.cmpi eq, %66, %93 : vector<8x128xi32>
    %95 = vector.shape_cast %92 : vector<8x1xf32> to vector<8x1xf32>
    %96 = vector.broadcast %95 : vector<8x1xf32> to vector<8x128xf32>
    %97 = arith.select %94, %96, %87 : vector<8x128xi1>, vector<8x128xf32>
    %98 = arith.mulf %44, %64 : vector<8x128xf32>
    %cst_53 = arith.constant dense<0.000000e+00> : vector<8xf32>
    %99 = vector.multi_reduction <add>, %98, %cst_53 [1] : vector<8x128xf32> to vector<8xf32>
    %100 = vector.shape_cast %99 : vector<8xf32> to vector<8x1xf32>
    %101 = vector.broadcast %65 : f32 to vector<8x1xf32>
    %102 = arith.addf %100, %101 : vector<8x1xf32>
    %c3_i32 = arith.constant 3 : i32
    %103 = vector.broadcast %c3_i32 : i32 to vector<8x128xi32>
    %104 = arith.cmpi eq, %66, %103 : vector<8x128xi32>
    %105 = vector.shape_cast %102 : vector<8x1xf32> to vector<8x1xf32>
    %106 = vector.broadcast %105 : vector<8x1xf32> to vector<8x128xf32>
    %107 = arith.select %104, %106, %97 : vector<8x128xi1>, vector<8x128xf32>
    %108 = arith.mulf %48, %64 : vector<8x128xf32>
    %cst_54 = arith.constant dense<0.000000e+00> : vector<8xf32>
    %109 = vector.multi_reduction <add>, %108, %cst_54 [1] : vector<8x128xf32> to vector<8xf32>
    %110 = vector.shape_cast %109 : vector<8xf32> to vector<8x1xf32>
    %111 = vector.broadcast %65 : f32 to vector<8x1xf32>
    %112 = arith.addf %110, %111 : vector<8x1xf32>
    %c4_i32 = arith.constant 4 : i32
    %113 = vector.broadcast %c4_i32 : i32 to vector<8x128xi32>
    %114 = arith.cmpi eq, %66, %113 : vector<8x128xi32>
    %115 = vector.shape_cast %112 : vector<8x1xf32> to vector<8x1xf32>
    %116 = vector.broadcast %115 : vector<8x1xf32> to vector<8x128xf32>
    %117 = arith.select %114, %116, %107 : vector<8x128xi1>, vector<8x128xf32>
    %118 = arith.mulf %52, %64 : vector<8x128xf32>
    %cst_55 = arith.constant dense<0.000000e+00> : vector<8xf32>
    %119 = vector.multi_reduction <add>, %118, %cst_55 [1] : vector<8x128xf32> to vector<8xf32>
    %120 = vector.shape_cast %119 : vector<8xf32> to vector<8x1xf32>
    %121 = vector.broadcast %65 : f32 to vector<8x1xf32>
    %122 = arith.addf %120, %121 : vector<8x1xf32>
    %c5_i32 = arith.constant 5 : i32
    %123 = vector.broadcast %c5_i32 : i32 to vector<8x128xi32>
    %124 = arith.cmpi eq, %66, %123 : vector<8x128xi32>
    %125 = vector.shape_cast %122 : vector<8x1xf32> to vector<8x1xf32>
    %126 = vector.broadcast %125 : vector<8x1xf32> to vector<8x128xf32>
    %127 = arith.select %124, %126, %117 : vector<8x128xi1>, vector<8x128xf32>
    %128 = arith.mulf %56, %64 : vector<8x128xf32>
    %cst_56 = arith.constant dense<0.000000e+00> : vector<8xf32>
    %129 = vector.multi_reduction <add>, %128, %cst_56 [1] : vector<8x128xf32> to vector<8xf32>
    %130 = vector.shape_cast %129 : vector<8xf32> to vector<8x1xf32>
    %131 = vector.broadcast %65 : f32 to vector<8x1xf32>
    %132 = arith.addf %130, %131 : vector<8x1xf32>
    %c6_i32 = arith.constant 6 : i32
    %133 = vector.broadcast %c6_i32 : i32 to vector<8x128xi32>
    %134 = arith.cmpi eq, %66, %133 : vector<8x128xi32>
    %135 = vector.shape_cast %132 : vector<8x1xf32> to vector<8x1xf32>
    %136 = vector.broadcast %135 : vector<8x1xf32> to vector<8x128xf32>
    %137 = arith.select %134, %136, %127 : vector<8x128xi1>, vector<8x128xf32>
    %138 = arith.mulf %60, %64 : vector<8x128xf32>
    %cst_57 = arith.constant dense<0.000000e+00> : vector<8xf32>
    %139 = vector.multi_reduction <add>, %138, %cst_57 [1] : vector<8x128xf32> to vector<8xf32>
    %140 = vector.shape_cast %139 : vector<8xf32> to vector<8x1xf32>
    %141 = vector.broadcast %65 : f32 to vector<8x1xf32>
    %142 = arith.addf %140, %141 : vector<8x1xf32>
    %c7_i32 = arith.constant 7 : i32
    %143 = vector.broadcast %c7_i32 : i32 to vector<8x128xi32>
    %144 = arith.cmpi eq, %66, %143 : vector<8x128xi32>
    %145 = vector.shape_cast %142 : vector<8x1xf32> to vector<8x1xf32>
    %146 = vector.broadcast %145 : vector<8x1xf32> to vector<8x128xf32>
    %147 = arith.select %144, %146, %137 : vector<8x128xi1>, vector<8x128xf32>
    %148 = arith.negf %147 : vector<8x128xf32>
    %149 = math.exp %148 : vector<8x128xf32>
    %cst_58 = arith.constant 1.000000e+00 : f32
    %150 = vector.broadcast %cst_58 : f32 to vector<8x128xf32>
    %151 = arith.addf %150, %149 : vector<8x128xf32>
    %152 = arith.divf %150, %151 : vector<8x128xf32>
    %c0_59 = arith.constant 0 : index
    %c0_60 = arith.constant 0 : index
    %153 = vector.load %arg6[%c0_59, %c0_60] : memref<8x128xf32, #tpu.memory_space<vmem>>, vector<8x128xf32>
    tpu.vector_store %arg6[%c0_59, %c0_60], %152 {strides = array<i32>} : memref<8x128xf32, #tpu.memory_space<vmem>>, vector<8x128xf32>,
    return
  }
}

</mosaic_0001>

<bundles_post_ra>
// kernel: model_forward.1
= control target key start
LH: loop header
LB: loop body
LE: loop exit
PB: predicated region body
PF: predicated region fallthrough
CT: control target
= control target key end

     0   :  { %v2557_v0 = vmov 0.0|0.0   ;;  %vm2558_vm0 = vmmov 0   ;;  %v2559_v4 = vmov 0.0   ;;  %s3097_s1 = inlined_call_operand.vmem [shape: f32[128,128], index: 1, kind: input, shape index: {}]   ;;  %s3098_s0 = inlined_call_operand.vmem [shape: f32[8,1024], index: 0, kind: input, shape index: {}]   ;;  %s3099_s2 = inlined_call_operand.vmem [shape: f32[128,128], index: 2, kind: input, shape index: {}]   ;;  %s3100_s3 = inlined_call_operand.vmem [shape: f32[1,128], index: 3, kind: input, shape index: {}]   ;;  %s3101_s4 = inlined_call_operand.vmem [shape: f32[1,128], index: 4, kind: input, shape index: {}]   ;;  %s3102_s7 = inlined_call_operand.vmem [shape: f32[8,1024], index: 7, kind: output, shape index: {1}]   ;;  %s3103_s5 = inlined_call_operand.<no memory space> [shape: f32[1], index: 5, kind: input, shape index: {}]   ;;  %s3104_s6 = inlined_call_operand.vmem [shape: f32[8,128], index: 6, kind: output, shape index: {0}]  }
   0x1   :  { %2126 = vmatprep.subr.bf16.mxu0 %v2557_v0  ;;  %v26_v1 = vld [vmem:[%s3097_s1] sm:$0xff]  ;;  %v27_v2 = vld [vmem:[%s3097_s1 + $0x8] sm:$0xff]  ;;  %v28_v3 = vld [vmem:[%s3097_s1 + $0x10] sm:$0xff]  ;;  %1598 = vmatprep.mubr.msk.f32.mxu0 %vm2558_vm0, %v2559_v4 }
   0x2   :  { %v2612_v5 = vpack.c.bf16 %v27_v2, %v26_v1  ;;  %v29_v6 = vld [vmem:[%s3097_s1 + $0x18] sm:$0xff]  ;;  %2150 = vmatprep.subr.bf16.mxu1 %v2557_v0  ;;  %1633 = vmatprep.mubr.msk.f32.mxu1 %vm2558_vm0, %v2559_v4  ;;  %v30_v8 = vld [vmem:[%s3097_s1 + $0x20] sm:$0xff]  ;;  %v31_v9 = vld [vmem:[%s3097_s1 + $0x28] sm:$0xff] }
   0x3   :  { %v2621_v7 = vpack.c.bf16 %v29_v6, %v28_v3  ;;  %v2633_v10 = vpack.c.bf16 %v31_v9, %v30_v8  ;;  %v32_v11 = vld [vmem:[%s3097_s1 + $0x30] sm:$0xff]  ;;  %v33_v12 = vld [vmem:[%s3097_s1 + $0x38] sm:$0xff]  ;;  %v34_v14 = vld [vmem:[%s3097_s1 + $0x40] sm:$0xff] }
   0x4   :  { %2128 = vmatpush3.bf16.msra.mxu0 %v2612_v5  ;;  %2152 = vmatpush3.bf16.msra.mxu1 %v2612_v5  ;;  %v2645_v13 = vpack.c.bf16 %v33_v12, %v32_v11  ;;  %v35_v15 = vld [vmem:[%s3097_s1 + $0x48] sm:$0xff]  ;;  %v36_v17 = vld [vmem:[%s3097_s1 + $0x50] sm:$0xff]  ;;  %v37_v18 = vld [vmem:[%s3097_s1 + $0x58] sm:$0xff] }
   0x5   :  { %2129 = vmatprep.subr.bf16.mxu0 %v2557_v0  ;;  %2153 = vmatprep.subr.bf16.mxu1 %v2557_v0  ;;  %v2657_v16 = vpack.c.bf16 %v35_v15, %v34_v14  ;;  %v2669_v19 = vpack.c.bf16 %v37_v18, %v36_v17  ;;  %v38_v20 = vld [vmem:[%s3097_s1 + $0x60] sm:$0xff]  ;;  %v39_v21 = vld [vmem:[%s3097_s1 + $0x68] sm:$0xff]  ;;  %v40_v23 = vld [vmem:[%s3097_s1 + $0x70] sm:$0xff] }
   0x6   :  { %v2681_v22 = vpack.c.bf16 %v39_v21, %v38_v20  ;;  %v41_v24 = vld [vmem:[%s3097_s1 + $0x78] sm:$0xff]  ;;  %v49_v26 = vld [vmem:[%s3098_s0] sm:$0xff]  ;;  %v120_v27 = vld [vmem:[%s3098_s0 + $0x8] sm:$0xff] }
   0x7   :  { %v2693_v25 = vpack.c.bf16 %v41_v24, %v40_v23  ;;  %v191_v28 = vld [vmem:[%s3098_s0 + $0x10] sm:$0xff]  ;;  %v262_v29 = vld [vmem:[%s3098_s0 + $0x18] sm:$0xff]  ;;  %v333_v30 = vld [vmem:[%s3098_s0 + $0x20] sm:$0xff] }
   0x8   :  { %2131 = vmatpush3.bf16.msra.mxu0 %v2621_v7  ;;  %2155 = vmatpush3.bf16.msra.mxu1 %v2621_v7  ;;  %v404_v31 = vld [vmem:[%s3098_s0 + $0x28] sm:$0xff]  ;;  %v617_v32 = vld [vmem:[%s3099_s2] sm:$0xff]  ;;  %v475_v34 = vld [vmem:[%s3098_s0 + $0x30] sm:$0xff] }
   0x9   :  { %2132 = vmatprep.subr.bf16.mxu0 %v2557_v0  ;;  %2156 = vmatprep.subr.bf16.mxu1 %v2557_v0  ;;  %v618_v33 = vld [vmem:[%s3099_s2 + $0x8] sm:$0xff]  ;;  %v619_v36 = vld [vmem:[%s3099_s2 + $0x10] sm:$0xff]  ;;  %v620_v37 = vld [vmem:[%s3099_s2 + $0x18] sm:$0xff] }
   0xa   :  { %v2834_v35 = vpack.c.bf16 %v618_v33, %v617_v32  ;;  %v546_v38 = vld [vmem:[%s3098_s0 + $0x38] sm:$0xff]  ;;  %v2849_v39 = vpack.c.bf16 %v620_v37, %v619_v36  ;;  %v621_v40 = vld [vmem:[%s3099_s2 + $0x20] sm:$0xff]  ;;  %v622_v41 = vld [vmem:[%s3099_s2 + $0x28] sm:$0xff]  ;;  %v1225_v37 = vlaneseq }
   0xb   :  { %v2865_v42 = vpack.c.bf16 %v622_v41, %v621_v40  ;;  %v623_v43 = vld [vmem:[%s3099_s2 + $0x30] sm:$0xff]  ;;  %v624_v44 = vld [vmem:[%s3099_s2 + $0x38] sm:$0xff]  ;;  %v625_v46 = vld [vmem:[%s3099_s2 + $0x40] sm:$0xff]  ;;  %v1230_v41 = vstv %s3103_s5 }
   0xc   :  { %2134 = vmatpush3.bf16.msra.mxu0 %v2633_v10  ;;  %2158 = vmatpush3.bf16.msra.mxu1 %v2633_v10  ;;  %v2877_v45 = vpack.c.bf16 %v624_v44, %v623_v43  ;;  %v626_v47 = vld [vmem:[%s3099_s2 + $0x48] sm:$0xff]  ;;  %v627_v49 = vld [vmem:[%s3099_s2 + $0x50] sm:$0xff]  ;;  %v628_v50 = vld [vmem:[%s3099_s2 + $0x58] sm:$0xff]  ;;  %v1226_v40 = vand.u32 127, %v1225_v37 }
   0xd   :  { %2135 = vmatprep.subr.bf16.mxu0 %v2557_v0  ;;  %2159 = vmatprep.subr.bf16.mxu1 %v2557_v0  ;;  %v2889_v48 = vpack.c.bf16 %v626_v47, %v625_v46  ;;  %v2901_v51 = vpack.c.bf16 %v628_v50, %v627_v49  ;;  %v629_v52 = vld [vmem:[%s3099_s2 + $0x60] sm:$0xff]  ;;  %v630_v53 = vld [vmem:[%s3099_s2 + $0x68] sm:$0xff]  ;;  %v631_v55 = vld [vmem:[%s3099_s2 + $0x70] sm:$0xff] }
   0xe   :  { %v2913_v54 = vpack.c.bf16 %v630_v53, %v629_v52  ;;  %v632_v56 = vld [vmem:[%s3099_s2 + $0x78] sm:$0xff]  ;;  %v2956_v58 = vld [vmem:[%s3100_s3] ss:$0 sm:$0xff]  ;;  %vm1232_vm1 = vcmp.eq.s32.totalorder %v1226_v40, 0  ;;  %vm1238_vm2 = vcmp.eq.s32.totalorder %v1226_v40, 1  ;;  %vm1244_vm3 = vcmp.eq.s32.totalorder %v1226_v40, 2 }
   0xf   :  { %v2925_v57 = vpack.c.bf16 %v632_v56, %v631_v55  ;;  %v2962_v62 = vld [vmem:[%s3101_s4] ss:$0 sm:$0xff]  ;;  %vm1250_vm4 = vcmp.eq.s32.totalorder %v1226_v40, 3  ;;  %vm1256_vm5 = vcmp.eq.s32.totalorder %v1226_v40, 4  ;;  %vm1262_vm6 = vcmp.eq.s32.totalorder %v1226_v40, 5 }
  0x10   :  { %2137 = vmatpush3.bf16.msra.mxu0 %v2645_v13  ;;  %2161 = vmatpush3.bf16.msra.mxu1 %v2645_v13  ;;  %vm1268_vm7 = vcmp.eq.s32.totalorder %v1226_v40, 6  ;;  %vm1274_vm8 = vcmp.eq.s32.totalorder %v1226_v40, 7 }
  0x11   :  { %2138 = vmatprep.subr.bf16.mxu0 %v2557_v0  ;;  %2162 = vmatprep.subr.bf16.mxu1 %v2557_v0 }
  0x14   :  { %2140 = vmatpush3.bf16.msra.mxu0 %v2657_v16  ;;  %2164 = vmatpush3.bf16.msra.mxu1 %v2657_v16 }
  0x15   :  { %2141 = vmatprep.subr.bf16.mxu0 %v2557_v0  ;;  %2165 = vmatprep.subr.bf16.mxu1 %v2557_v0 }
  0x18   :  { %2143 = vmatpush3.bf16.msra.mxu0 %v2669_v19  ;;  %2167 = vmatpush3.bf16.msra.mxu1 %v2669_v19 }
  0x19   :  { %2144 = vmatprep.subr.bf16.mxu0 %v2557_v0  ;;  %2168 = vmatprep.subr.bf16.mxu1 %v2557_v0 }
  0x1c   :  { %2146 = vmatpush3.bf16.msra.mxu0 %v2681_v22  ;;  %2170 = vmatpush3.bf16.msra.mxu1 %v2681_v22 }
  0x1d   :  { %2147 = vmatprep.subr.bf16.mxu0 %v2557_v0  ;;  %2171 = vmatprep.subr.bf16.mxu1 %v2557_v0 }
  0x20   :  { %2149 = vmatpush3.bf16.msra.mxu0 %v2693_v25  ;;  %2173 = vmatpush3.bf16.msra.mxu1 %v2693_v25 }
  0x21   :  { %2174 = vmatprep.subr.bf16.mxu0 %v2557_v0  ;;  %2198 = vmatprep.subr.bf16.mxu1 %v2557_v0 }
  0x23   :  { %1599 = vmatmul.mubr.f32.vlgmr.msra.gmra.mrb[0].mxu0 %v49_v26  ;;  %1634 = vmatmul.mubr.f32.vlgmr.msra.gmra.mrb[0].mxu1 %v120_v27 }
  0x24   :  { %2176 = vmatpush3.bf16.msra.mxu0 %v2612_v5  ;;  %1668 = vmatprep.mubr.msk.f32.mxu0 %vm2558_vm0, %v2559_v4 }
  0x25   :  { %2177 = vmatprep.subr.bf16.mxu0 %v2557_v0  ;;  %2200 = vmatpush3.bf16.msra.mxu1 %v2612_v5 }
  0x26   :  { %1703 = vmatprep.mubr.msk.f32.mxu1 %vm2558_vm0, %v2559_v4  ;;  %2201 = vmatprep.subr.bf16.mxu1 %v2557_v0 }
  0x28   :  { %2179 = vmatpush3.bf16.msra.mxu0 %v2621_v7 }
  0x29   :  { %2180 = vmatprep.subr.bf16.mxu0 %v2557_v0  ;;  %2203 = vmatpush3.bf16.msra.mxu1 %v2621_v7 }
  0x2a   :  { %2204 = vmatprep.subr.bf16.mxu1 %v2557_v0 }
  0x2c   :  { %2182 = vmatpush3.bf16.msra.mxu0 %v2633_v10 }
  0x2d   :  { %2183 = vmatprep.subr.bf16.mxu0 %v2557_v0  ;;  %2206 = vmatpush3.bf16.msra.mxu1 %v2633_v10 }
  0x2e   :  { %2207 = vmatprep.subr.bf16.mxu1 %v2557_v0 }
  0x30   :  { %2185 = vmatpush3.bf16.msra.mxu0 %v2645_v13 }
  0x31   :  { %2186 = vmatprep.subr.bf16.mxu0 %v2557_v0  ;;  %2209 = vmatpush3.bf16.msra.mxu1 %v2645_v13 }
  0x32   :  { %2210 = vmatprep.subr.bf16.mxu1 %v2557_v0 }
  0x34   :  { %2188 = vmatpush3.bf16.msra.mxu0 %v2657_v16 }
  0x35   :  { %2189 = vmatprep.subr.bf16.mxu0 %v2557_v0  ;;  %2212 = vmatpush3.bf16.msra.mxu1 %v2657_v16 }
  0x36   :  { %2213 = vmatprep.subr.bf16.mxu1 %v2557_v0 }
  0x38   :  { %2191 = vmatpush3.bf16.msra.mxu0 %v2669_v19 }
  0x39   :  { %2192 = vmatprep.subr.bf16.mxu0 %v2557_v0  ;;  %2215 = vmatpush3.bf16.msra.mxu1 %v2669_v19 }
  0x3a   :  { %2216 = vmatprep.subr.bf16.mxu1 %v2557_v0 }
  0x3c   :  { %2194 = vmatpush3.bf16.msra.mxu0 %v2681_v22 }
  0x3d   :  { %2195 = vmatprep.subr.bf16.mxu0 %v2557_v0  ;;  %2218 = vmatpush3.bf16.msra.mxu1 %v2681_v22 }
  0x3e   :  { %2219 = vmatprep.subr.bf16.mxu1 %v2557_v0 }
  0x40   :  { %2197 = vmatpush3.bf16.msra.mxu0 %v2693_v25 }
  0x41   :  { %2222 = vmatprep.subr.bf16.mxu0 %v2557_v0  ;;  %2221 = vmatpush3.bf16.msra.mxu1 %v2693_v25 }
  0x42   :  { %2246 = vmatprep.subr.bf16.mxu1 %v2557_v0 }
  0x43   :  { %1669 = vmatmul.mubr.f32.vlgmr.msra.gmra.mrb[2].mxu0 %v191_v28 }
  0x44   :  { %2224 = vmatpush3.bf16.msra.mxu0 %v2612_v5  ;;  %1738 = vmatprep.mubr.msk.f32.mxu0 %vm2558_vm0, %v2559_v4 }
  0x45   :  { %2225 = vmatprep.subr.bf16.mxu0 %v2557_v0  ;;  %1704 = vmatmul.mubr.f32.vlgmr.msra.gmra.mrb[2].mxu1 %v262_v29 }
  0x46   :  { %2248 = vmatpush3.bf16.msra.mxu1 %v2612_v5  ;;  %1773 = vmatprep.mubr.msk.f32.mxu1 %vm2558_vm0, %v2559_v4 }
  0x47   :  { %2249 = vmatprep.subr.bf16.mxu1 %v2557_v0 }
  0x48   :  { %2227 = vmatpush3.bf16.msra.mxu0 %v2621_v7 }
  0x49   :  { %2228 = vmatprep.subr.bf16.mxu0 %v2557_v0 }
  0x4a   :  { %2251 = vmatpush3.bf16.msra.mxu1 %v2621_v7 }
  0x4b   :  { %2252 = vmatprep.subr.bf16.mxu1 %v2557_v0 }
  0x4c   :  { %2230 = vmatpush3.bf16.msra.mxu0 %v2633_v10 }
  0x4d   :  { %2231 = vmatprep.subr.bf16.mxu0 %v2557_v0 }
  0x4e   :  { %2254 = vmatpush3.bf16.msra.mxu1 %v2633_v10 }
  0x4f   :  { %2255 = vmatprep.subr.bf16.mxu1 %v2557_v0 }
  0x50   :  { %2233 = vmatpush3.bf16.msra.mxu0 %v2645_v13 }
  0x51   :  { %2234 = vmatprep.subr.bf16.mxu0 %v2557_v0 }
  0x52   :  { %2257 = vmatpush3.bf16.msra.mxu1 %v2645_v13 }
  0x53   :  { %2258 = vmatprep.subr.bf16.mxu1 %v2557_v0 }
  0x54   :  { %2236 = vmatpush3.bf16.msra.mxu0 %v2657_v16 }
  0x55   :  { %2237 = vmatprep.subr.bf16.mxu0 %v2557_v0 }
  0x56   :  { %2260 = vmatpush3.bf16.msra.mxu1 %v2657_v16 }
  0x57   :  { %2261 = vmatprep.subr.bf16.mxu1 %v2557_v0 }
  0x58   :  { %2239 = vmatpush3.bf16.msra.mxu0 %v2669_v19 }
  0x59   :  { %2240 = vmatprep.subr.bf16.mxu0 %v2557_v0 }
  0x5a   :  { %2263 = vmatpush3.bf16.msra.mxu1 %v2669_v19 }
  0x5b   :  { %2264 = vmatprep.subr.bf16.mxu1 %v2557_v0 }
  0x5c   :  { %2242 = vmatpush3.bf16.msra.mxu0 %v2681_v22 }
  0x5d   :  { %2243 = vmatprep.subr.bf16.mxu0 %v2557_v0 }
  0x5e   :  { %2266 = vmatpush3.bf16.msra.mxu1 %v2681_v22 }
  0x5f   :  { %2267 = vmatprep.subr.bf16.mxu1 %v2557_v0 }
  0x60   :  { %2245 = vmatpush3.bf16.msra.mxu0 %v2693_v25 }
  0x61   :  { %2270 = vmatprep.subr.bf16.mxu0 %v2557_v0 }
  0x62   :  { %2269 = vmatpush3.bf16.msra.mxu1 %v2693_v25 }
  0x63   :  { %1739 = vmatmul.mubr.f32.vlgmr.msra.gmra.mrb[4].mxu0 %v333_v30  ;;  %2294 = vmatprep.subr.bf16.mxu1 %v2557_v0 }
  0x64   :  { %2272 = vmatpush3.bf16.msra.mxu0 %v2612_v5  ;;  %1808 = vmatprep.mubr.msk.f32.mxu0 %vm2558_vm0, %v2559_v4 }
  0x65   :  { %2273 = vmatprep.subr.bf16.mxu0 %v2557_v0  ;;  %1774 = vmatmul.mubr.f32.vlgmr.msra.gmra.mrb[4].mxu1 %v404_v31 }
  0x66   :  { %2296 = vmatpush3.bf16.msra.mxu1 %v2612_v5  ;;  %1843 = vmatprep.mubr.msk.f32.mxu1 %vm2558_vm0, %v2559_v4 }
  0x67   :  { %2297 = vmatprep.subr.bf16.mxu1 %v2557_v0 }
  0x68   :  { %2275 = vmatpush3.bf16.msra.mxu0 %v2621_v7 }
  0x69   :  { %2276 = vmatprep.subr.bf16.mxu0 %v2557_v0 }
  0x6a   :  { %2299 = vmatpush3.bf16.msra.mxu1 %v2621_v7 }
  0x6b   :  { %2300 = vmatprep.subr.bf16.mxu1 %v2557_v0 }
  0x6c   :  { %2278 = vmatpush3.bf16.msra.mxu0 %v2633_v10 }
  0x6d   :  { %2279 = vmatprep.subr.bf16.mxu0 %v2557_v0 }
  0x6e   :  { %2302 = vmatpush3.bf16.msra.mxu1 %v2633_v10 }
  0x6f   :  { %2303 = vmatprep.subr.bf16.mxu1 %v2557_v0 }
  0x70   :  { %2281 = vmatpush3.bf16.msra.mxu0 %v2645_v13 }
  0x71   :  { %2282 = vmatprep.subr.bf16.mxu0 %v2557_v0 }
  0x72   :  { %2305 = vmatpush3.bf16.msra.mxu1 %v2645_v13 }
  0x73   :  { %2306 = vmatprep.subr.bf16.mxu1 %v2557_v0 }
  0x74   :  { %2284 = vmatpush3.bf16.msra.mxu0 %v2657_v16 }
  0x75   :  { %2285 = vmatprep.subr.bf16.mxu0 %v2557_v0 }
  0x76   :  { %2308 = vmatpush3.bf16.msra.mxu1 %v2657_v16 }
  0x77   :  { %2309 = vmatprep.subr.bf16.mxu1 %v2557_v0 }
  0x78   :  { %2287 = vmatpush3.bf16.msra.mxu0 %v2669_v19 }
  0x79   :  { %2288 = vmatprep.subr.bf16.mxu0 %v2557_v0 }
  0x7a   :  { %2311 = vmatpush3.bf16.msra.mxu1 %v2669_v19 }
  0x7b   :  { %2312 = vmatprep.subr.bf16.mxu1 %v2557_v0 }
  0x7c   :  { %2290 = vmatpush3.bf16.msra.mxu0 %v2681_v22 }
  0x7d   :  { %2291 = vmatprep.subr.bf16.mxu0 %v2557_v0 }
  0x7e   :  { %2314 = vmatpush3.bf16.msra.mxu1 %v2681_v22 }
  0x7f   :  { %2315 = vmatprep.subr.bf16.mxu1 %v2557_v0 }
  0x80   :  { %2293 = vmatpush3.bf16.msra.mxu0 %v2693_v25 }
  0x81   :  { %2318 = vmatprep.subr.bf16.mxu0 %v2557_v0 }
  0x82   :  { %2317 = vmatpush3.bf16.msra.mxu1 %v2693_v25 }
  0x83   :  { %1809 = vmatmul.mubr.f32.vlgmr.msra.gmra.mrb[6].mxu0 %v475_v34  ;;  %2342 = vmatprep.subr.bf16.mxu1 %v2557_v0 }
  0x84   :  { %2320 = vmatpush3.bf16.msra.mxu0 %v2834_v35  ;;  %1878 = vmatprep.mubr.msk.f32.mxu0 %vm2558_vm0, %v2559_v4 }
  0x85   :  { %2321 = vmatprep.subr.bf16.mxu0 %v2557_v0  ;;  %1844 = vmatmul.mubr.f32.vlgmr.msra.gmra.mrb[6].mxu1 %v546_v38 }
  0x86   :  { %2344 = vmatpush3.bf16.msra.mxu1 %v2834_v35  ;;  %1913 = vmatprep.mubr.msk.f32.mxu1 %vm2558_vm0, %v2559_v4 }
  0x87   :  { %2345 = vmatprep.subr.bf16.mxu1 %v2557_v0 }
  0x88   :  { %2323 = vmatpush3.bf16.msra.mxu0 %v2849_v39 }
  0x89   :  { %2324 = vmatprep.subr.bf16.mxu0 %v2557_v0 }
  0x8a   :  { %2347 = vmatpush3.bf16.msra.mxu1 %v2849_v39 }
  0x8b   :  { %2348 = vmatprep.subr.bf16.mxu1 %v2557_v0 }
  0x8c   :  { %2326 = vmatpush3.bf16.msra.mxu0 %v2865_v42 }
  0x8d   :  { %2327 = vmatprep.subr.bf16.mxu0 %v2557_v0 }
  0x8e   :  { %2350 = vmatpush3.bf16.msra.mxu1 %v2865_v42 }
  0x8f   :  { %2351 = vmatprep.subr.bf16.mxu1 %v2557_v0 }
  0x90   :  { %2329 = vmatpush3.bf16.msra.mxu0 %v2877_v45 }
  0x91   :  { %2330 = vmatprep.subr.bf16.mxu0 %v2557_v0 }
  0x92   :  { %2353 = vmatpush3.bf16.msra.mxu1 %v2877_v45 }
  0x93   :  { %2354 = vmatprep.subr.bf16.mxu1 %v2557_v0 }
  0x94   :  { %2332 = vmatpush3.bf16.msra.mxu0 %v2889_v48 }
  0x95   :  { %2333 = vmatprep.subr.bf16.mxu0 %v2557_v0 }
  0x96   :  { %2356 = vmatpush3.bf16.msra.mxu1 %v2889_v48 }
  0x97   :  { %2357 = vmatprep.subr.bf16.mxu1 %v2557_v0 }
  0x98   :  { %2335 = vmatpush3.bf16.msra.mxu0 %v2901_v51 }
  0x99   :  { %2336 = vmatprep.subr.bf16.mxu0 %v2557_v0 }
  0x9a   :  { %2359 = vmatpush3.bf16.msra.mxu1 %v2901_v51 }
  0x9b   :  { %2360 = vmatprep.subr.bf16.mxu1 %v2557_v0 }
  0x9c   :  { %2338 = vmatpush3.bf16.msra.mxu0 %v2913_v54 }
  0x9d   :  { %2339 = vmatprep.subr.bf16.mxu0 %v2557_v0 }
  0x9e   :  { %2362 = vmatpush3.bf16.msra.mxu1 %v2913_v54 }
  0x9f   :  { %2363 = vmatprep.subr.bf16.mxu1 %v2557_v0 }
  0xa0   :  { %2341 = vmatpush3.bf16.msra.mxu0 %v2925_v57 }
  0xa1   :  { %2366 = vmatprep.subr.bf16.mxu0 %v2557_v0 }
  0xa2   :  { %2365 = vmatpush3.bf16.msra.mxu1 %v2925_v57 }
  0xa3   :  { %1879 = vmatmul.mubr.f32.vlgmr.msra.gmra.mrb[0].mxu0 %v2559_v4  ;;  %2390 = vmatprep.subr.bf16.mxu1 %v2557_v0 }
  0xa4   :  { %2368 = vmatpush3.bf16.msra.mxu0 %v2834_v35  ;;  %1948 = vmatprep.mubr.msk.f32.mxu0 %vm2558_vm0, %v2559_v4 }
  0xa5   :  { %2369 = vmatprep.subr.bf16.mxu0 %v2557_v0 }
  0xa8   :  { %2371 = vmatpush3.bf16.msra.mxu0 %v2849_v39 }
  0xa9   :  { %2372 = vmatprep.subr.bf16.mxu0 %v2557_v0 }
  0xac   :  { %2374 = vmatpush3.bf16.msra.mxu0 %v2865_v42 }
  0xad   :  { %2375 = vmatprep.subr.bf16.mxu0 %v2557_v0 }
  0xb0   :  { %2377 = vmatpush3.bf16.msra.mxu0 %v2877_v45 }
  0xb1   :  { %2378 = vmatprep.subr.bf16.mxu0 %v2557_v0 }
  0xb4   :  { %2380 = vmatpush3.bf16.msra.mxu0 %v2889_v48 }
  0xb5   :  { %2381 = vmatprep.subr.bf16.mxu0 %v2557_v0 }
  0xb8   :  { %2383 = vmatpush3.bf16.msra.mxu0 %v2901_v51 }
  0xb9   :  { %2384 = vmatprep.subr.bf16.mxu0 %v2557_v0 }
  0xbc   :  { %2386 = vmatpush3.bf16.msra.mxu0 %v2913_v54 }
  0xbd   :  { %2387 = vmatprep.subr.bf16.mxu0 %v2557_v0 }
  0xc0   :  { %2389 = vmatpush3.bf16.msra.mxu0 %v2925_v57 }
  0xc1   :  { %2414 = vmatprep.subr.bf16.mxu0 %v2557_v0 }
 0x176   :  { %v699_v59 = vpop.f32.mrb[0].mxu0 }
 0x177   :  { %v2510_v60 = vadd.f32 %v2956_v58, %v699_v59  ;;  %v1880_v61 = vpop.f32.mrb[1].mxu0 }
 0x179   :  { %2537 = vtanh.f32 %v2510_v60 }
 0x183   :  { %v2538_v63 = vpop.eup %2537 }
 0x184   :  { %705 = vst [vmem:[%s3102_s7] sm:$0xff] %v2538_v63  ;;  %1914 = vmatmul.mubr.f32.vlgmr.msra.gmra.mrb[0].mxu1 %v2538_v63  ;;  %v1227_v1 = vmul.f32 %v2538_v63, %v2962_v62 }
 0x185   :  { %2392 = vmatpush3.bf16.msra.mxu1 %v2834_v35  ;;  %1983 = vmatprep.mubr.msk.f32.mxu1 %vm2558_vm0, %v2559_v4 }
 0x186   :  { %1228 = vadd.xlane.f32.xlu0 %v1227_v1  ;;  %2393 = vmatprep.subr.bf16.mxu1 %v2557_v0 }
 0x189   :  { %2395 = vmatpush3.bf16.msra.mxu1 %v2849_v39 }
 0x18a   :  { %2396 = vmatprep.subr.bf16.mxu1 %v2557_v0 }
 0x18d   :  { %2398 = vmatpush3.bf16.msra.mxu1 %v2865_v42 }
 0x18e   :  { %2399 = vmatprep.subr.bf16.mxu1 %v2557_v0 }
 0x191   :  { %2401 = vmatpush3.bf16.msra.mxu1 %v2877_v45 }
 0x192   :  { %2402 = vmatprep.subr.bf16.mxu1 %v2557_v0 }
 0x195   :  { %2404 = vmatpush3.bf16.msra.mxu1 %v2889_v48 }
 0x196   :  { %2405 = vmatprep.subr.bf16.mxu1 %v2557_v0 }
 0x199   :  { %2407 = vmatpush3.bf16.msra.mxu1 %v2901_v51 }
 0x19a   :  { %2408 = vmatprep.subr.bf16.mxu1 %v2557_v0 }
 0x19d   :  { %2410 = vmatpush3.bf16.msra.mxu1 %v2913_v54 }
 0x19e   :  { %2411 = vmatprep.subr.bf16.mxu1 %v2557_v0 }
 0x1a1   :  { %2413 = vmatpush3.bf16.msra.mxu1 %v2925_v57 }
 0x1a2   :  { %2438 = vmatprep.subr.bf16.mxu1 %v2557_v0 }
 0x213   :  { %v1229_v36 = vpop.xlane.xlu0 %1228 }
 0x214   :  { %v1231_v44 = vadd.f32 %v1230_v41, %v1229_v36 }
 0x216   :  { %v1233_v50 = vsel %vm1232_vm1, %v1231_v44, 0.0 }
 0x257   :  { %v772_v2 = vpop.f32.mrb[0].mxu1 }
 0x258   :  { %v2511_v3 = vadd.f32 %v2956_v58, %v772_v2  ;;  %v1915_v5 = vpop.f32.mrb[1].mxu1 }
 0x25a   :  { %2539 = vtanh.f32 %v2511_v3 }
 0x264   :  { %v2540_v6 = vpop.eup %2539 }
 0x265   :  { %778 = vst [vmem:[%s3102_s7 + $0x8] sm:$0xff] %v2540_v6  ;;  %1949 = vmatmul.mubr.f32.vlgmr.msra.gmra.mrb[2].mxu0 %v2540_v6  ;;  %v1234_v7 = vmul.f32 %v2540_v6, %v2962_v62 }
 0x266   :  { %2416 = vmatpush3.bf16.msra.mxu0 %v2834_v35  ;;  %2018 = vmatprep.mubr.msk.f32.mxu0 %vm2558_vm0, %v2559_v4 }
 0x267   :  { %1235 = vadd.xlane.f32.xlu0 %v1234_v7  ;;  %2417 = vmatprep.subr.bf16.mxu0 %v2557_v0 }
 0x26a   :  { %2419 = vmatpush3.bf16.msra.mxu0 %v2849_v39 }
 0x26b   :  { %2420 = vmatprep.subr.bf16.mxu0 %v2557_v0 }
 0x26e   :  { %2422 = vmatpush3.bf16.msra.mxu0 %v2865_v42 }
 0x26f   :  { %2423 = vmatprep.subr.bf16.mxu0 %v2557_v0 }
 0x272   :  { %2425 = vmatpush3.bf16.msra.mxu0 %v2877_v45 }
 0x273   :  { %2426 = vmatprep.subr.bf16.mxu0 %v2557_v0 }
 0x276   :  { %2428 = vmatpush3.bf16.msra.mxu0 %v2889_v48 }
 0x277   :  { %2429 = vmatprep.subr.bf16.mxu0 %v2557_v0 }
 0x27a   :  { %2431 = vmatpush3.bf16.msra.mxu0 %v2901_v51 }
 0x27b   :  { %2432 = vmatprep.subr.bf16.mxu0 %v2557_v0 }
 0x27e   :  { %2434 = vmatpush3.bf16.msra.mxu0 %v2913_v54 }
 0x27f   :  { %2435 = vmatprep.subr.bf16.mxu0 %v2557_v0 }
 0x282   :  { %2437 = vmatpush3.bf16.msra.mxu0 %v2925_v57 }
 0x283   :  { %2462 = vmatprep.subr.bf16.mxu0 %v2557_v0 }
 0x338   :  { %v845_v8 = vpop.f32.mrb[2].mxu0 }
 0x339   :  { %v2512_v9 = vadd.f32 %v2956_v58, %v845_v8  ;;  %v1950_v10 = vpop.f32.mrb[3].mxu0 }
 0x33b   :  { %2541 = vtanh.f32 %v2512_v9 }
 0x345   :  { %v2542_v11 = vpop.eup %2541 }
 0x346   :  { %851 = vst [vmem:[%s3102_s7 + $0x10] sm:$0xff] %v2542_v11  ;;  %1984 = vmatmul.mubr.f32.vlgmr.msra.gmra.mrb[2].mxu1 %v2542_v11  ;;  %v1240_v12 = vmul.f32 %v2542_v11, %v2962_v62 }
 0x347   :  { %2440 = vmatpush3.bf16.msra.mxu1 %v2834_v35  ;;  %2053 = vmatprep.mubr.msk.f32.mxu1 %vm2558_vm0, %v2559_v4 }
 0x348   :  { %1241 = vadd.xlane.f32.xlu1 %v1240_v12  ;;  %2441 = vmatprep.subr.bf16.mxu1 %v2557_v0 }
 0x34b   :  { %2443 = vmatpush3.bf16.msra.mxu1 %v2849_v39 }
 0x34c   :  { %2444 = vmatprep.subr.bf16.mxu1 %v2557_v0 }
 0x34f   :  { %2446 = vmatpush3.bf16.msra.mxu1 %v2865_v42 }
 0x350   :  { %2447 = vmatprep.subr.bf16.mxu1 %v2557_v0 }
 0x353   :  { %2449 = vmatpush3.bf16.msra.mxu1 %v2877_v45 }
 0x354   :  { %2450 = vmatprep.subr.bf16.mxu1 %v2557_v0 }
 0x357   :  { %2452 = vmatpush3.bf16.msra.mxu1 %v2889_v48 }
 0x358   :  { %2453 = vmatprep.subr.bf16.mxu1 %v2557_v0 }
 0x35b   :  { %2455 = vmatpush3.bf16.msra.mxu1 %v2901_v51 }
 0x35c   :  { %2456 = vmatprep.subr.bf16.mxu1 %v2557_v0 }
 0x35f   :  { %2458 = vmatpush3.bf16.msra.mxu1 %v2913_v54 }
 0x360   :  { %2459 = vmatprep.subr.bf16.mxu1 %v2557_v0 }
 0x363   :  { %2461 = vmatpush3.bf16.msra.mxu1 %v2925_v57 }
 0x364   :  { %2486 = vmatprep.subr.bf16.mxu1 %v2557_v0 }
 0x3d5   :  { %v1242_v38 = vpop.xlane.xlu1 %1241 }
 0x3d6   :  { %v1243_v46 = vadd.f32 %v1242_v38, %v1230_v41 }
 0x419   :  { %v918_v13 = vpop.f32.mrb[2].mxu1 }
 0x41a   :  { %v2513_v14 = vadd.f32 %v2956_v58, %v918_v13  ;;  %v1985_v15 = vpop.f32.mrb[3].mxu1 }
 0x41c   :  { %2543 = vtanh.f32 %v2513_v14 }
 0x426   :  { %v2544_v16 = vpop.eup %2543 }
 0x427   :  { %924 = vst [vmem:[%s3102_s7 + $0x18] sm:$0xff] %v2544_v16  ;;  %2019 = vmatmul.mubr.f32.vlgmr.msra.gmra.mrb[4].mxu0 %v2544_v16  ;;  %v1246_v17 = vmul.f32 %v2544_v16, %v2962_v62 }
 0x428   :  { %2464 = vmatpush3.bf16.msra.mxu0 %v2834_v35  ;;  %2088 = vmatprep.mubr.msk.f32.mxu0 %vm2558_vm0, %v2559_v4 }
 0x429   :  { %1247 = vadd.xlane.f32.xlu1 %v1246_v17  ;;  %2465 = vmatprep.subr.bf16.mxu0 %v2557_v0 }
 0x42c   :  { %2467 = vmatpush3.bf16.msra.mxu0 %v2849_v39 }
 0x42d   :  { %2468 = vmatprep.subr.bf16.mxu0 %v2557_v0 }
 0x430   :  { %2470 = vmatpush3.bf16.msra.mxu0 %v2865_v42 }
 0x431   :  { %2471 = vmatprep.subr.bf16.mxu0 %v2557_v0 }
 0x434   :  { %2473 = vmatpush3.bf16.msra.mxu0 %v2877_v45 }
 0x435   :  { %2474 = vmatprep.subr.bf16.mxu0 %v2557_v0 }
 0x438   :  { %2476 = vmatpush3.bf16.msra.mxu0 %v2889_v48 }
 0x439   :  { %2477 = vmatprep.subr.bf16.mxu0 %v2557_v0 }
 0x43c   :  { %2479 = vmatpush3.bf16.msra.mxu0 %v2901_v51 }
 0x43d   :  { %2480 = vmatprep.subr.bf16.mxu0 %v2557_v0 }
 0x440   :  { %2482 = vmatpush3.bf16.msra.mxu0 %v2913_v54 }
 0x441   :  { %2483 = vmatprep.subr.bf16.mxu0 %v2557_v0 }
 0x444   :  { %2485 = vmatpush3.bf16.msra.mxu0 %v2925_v57 }
 0x4fa   :  { %v991_v18 = vpop.f32.mrb[4].mxu0 }
 0x4fb   :  { %v2514_v19 = vadd.f32 %v2956_v58, %v991_v18  ;;  %v2020_v20 = vpop.f32.mrb[5].mxu0 }
 0x4fd   :  { %2545 = vtanh.f32 %v2514_v19 }
 0x507   :  { %v2546_v21 = vpop.eup %2545 }
 0x508   :  { %997 = vst [vmem:[%s3102_s7 + $0x20] sm:$0xff] %v2546_v21  ;;  %2054 = vmatmul.mubr.f32.vlgmr.msra.gmra.mrb[4].mxu1 %v2546_v21  ;;  %v1252_v22 = vmul.f32 %v2546_v21, %v2962_v62 }
 0x509   :  { %2488 = vmatpush3.bf16.msra.mxu1 %v2834_v35  ;;  %2123 = vmatprep.mubr.msk.f32.mxu1 %vm2558_vm0, %v2559_v4 }
 0x50a   :  { %1253 = vadd.xlane.f32.xlu0 %v1252_v22  ;;  %2489 = vmatprep.subr.bf16.mxu1 %v2557_v0 }
 0x50d   :  { %2491 = vmatpush3.bf16.msra.mxu1 %v2849_v39  ;;  %v1236_v39 = vpop.xlane.xlu0 %1235 }
 0x50e   :  { %2492 = vmatprep.subr.bf16.mxu1 %v2557_v0 }
 0x511   :  { %2494 = vmatpush3.bf16.msra.mxu1 %v2865_v42  ;;  %v1248_v42 = vpop.xlane.xlu1 %1247 }
 0x512   :  { %2495 = vmatprep.subr.bf16.mxu1 %v2557_v0 }
 0x515   :  { %2497 = vmatpush3.bf16.msra.mxu1 %v2877_v45  ;;  %v1237_v45 = vadd.f32 %v1236_v39, %v1230_v41 }
 0x516   :  { %2498 = vmatprep.subr.bf16.mxu1 %v2557_v0 }
 0x517   :  { %v1239_v52 = vsel %vm1238_vm2, %v1237_v45, %v1233_v50 }
 0x519   :  { %2500 = vmatpush3.bf16.msra.mxu1 %v2889_v48  ;;  %v1249_v48 = vadd.f32 %v1248_v42, %v1230_v41 }
 0x51a   :  { %2501 = vmatprep.subr.bf16.mxu1 %v2557_v0 }
 0x51d   :  { %2503 = vmatpush3.bf16.msra.mxu1 %v2901_v51 }
 0x51e   :  { %2504 = vmatprep.subr.bf16.mxu1 %v2557_v0 }
 0x521   :  { %2506 = vmatpush3.bf16.msra.mxu1 %v2913_v54  ;;  %v1245_v54 = vsel %vm1244_vm3, %v1243_v46, %v1239_v52 }
 0x522   :  { %2507 = vmatprep.subr.bf16.mxu1 %v2557_v0  ;;  %v1251_v56 = vsel %vm1250_vm4, %v1249_v48, %v1245_v54 }
 0x525   :  { %2509 = vmatpush3.bf16.msra.mxu1 %v2925_v57 }
 0x597   :  { %v1254_v43 = vpop.xlane.xlu0 %1253 }
 0x598   :  { %v1255_v51 = vadd.f32 %v1254_v43, %v1230_v41 }
 0x59a   :  { %v1257_v57 = vsel %vm1256_vm5, %v1255_v51, %v1251_v56 }
 0x5db   :  { %v1064_v4 = vpop.f32.mrb[4].mxu1 }
 0x5dc   :  { %v2515_v23 = vadd.f32 %v2956_v58, %v1064_v4  ;;  %v2055_v24 = vpop.f32.mrb[5].mxu1 }
 0x5de   :  { %2547 = vtanh.f32 %v2515_v23 }
 0x5e8   :  { %v2548_v25 = vpop.eup %2547 }
 0x5e9   :  { %1070 = vst [vmem:[%s3102_s7 + $0x28] sm:$0xff] %v2548_v25  ;;  %2089 = vmatmul.mubr.f32.vlgmr.msra.gmra.mrb[6].mxu0 %v2548_v25  ;;  %v1258_v26 = vmul.f32 %v2548_v25, %v2962_v62 }
 0x5eb   :  { %1259 = vadd.xlane.f32.xlu1 %v1258_v26 }
 0x678   :  { %v1260_v47 = vpop.xlane.xlu1 %1259 }
 0x679   :  { %v1261_v53 = vadd.f32 %v1260_v47, %v1230_v41 }
 0x67b   :  { %v1263_v59 = vsel %vm1262_vm6, %v1261_v53, %v1257_v57 }
 0x6bc   :  { %v1137_v27 = vpop.f32.mrb[6].mxu0 }
 0x6bd   :  { %v2516_v28 = vadd.f32 %v2956_v58, %v1137_v27  ;;  %v2090_v0 = vpop.f32.mrb[7].mxu0 }
 0x6bf   :  { %2549 = vtanh.f32 %v2516_v28 }
 0x6c9   :  { %v2550_v29 = vpop.eup %2549 }
 0x6ca   :  { %1143 = vst [vmem:[%s3102_s7 + $0x30] sm:$0xff] %v2550_v29  ;;  %2124 = vmatmul.mubr.f32.vlgmr.msra.gmra.mrb[6].mxu1 %v2550_v29  ;;  %v1264_v30 = vmul.f32 %v2550_v29, %v2962_v62 }
 0x6cc   :  { %1265 = vadd.xlane.f32.xlu0 %v1264_v30 }
 0x759   :  { %v1266_v49 = vpop.xlane.xlu0 %1265 }
 0x75a   :  { %v1267_v55 = vadd.f32 %v1266_v49, %v1230_v41 }
 0x75c   :  { %v1269_v61 = vsel %vm1268_vm7, %v1267_v55, %v1263_v59 }
 0x79d   :  { %v1210_v31 = vpop.f32.mrb[6].mxu1 }
 0x79e   :  { %v2517_v32 = vadd.f32 %v2956_v58, %v1210_v31  ;;  %v2125_v33 = vpop.f32.mrb[7].mxu1 }
 0x7a0   :  { %2551 = vtanh.f32 %v2517_v32 }
 0x7aa   :  { %v2552_v34 = vpop.eup %2551 }
 0x7ab   :  { %1216 = vst [vmem:[%s3102_s7 + $0x38] sm:$0xff] %v2552_v34  ;;  %v1270_v35 = vmul.f32 %v2552_v34, %v2962_v62 }
 0x7ad   :  { %1271 = vadd.xlane.f32.xlu1 %v1270_v35 }
 0x83a   :  { %v1272_v58 = vpop.xlane.xlu1 %1271 }
 0x83b   :  { %v1273_v60 = vadd.f32 %v1272_v58, %v1230_v41 }
 0x83d   :  { %v1275_v62 = vsel %vm1274_vm8, %v1273_v60, %v1269_v61 }
 0x83e   :  { %v1293_v63 = vmul.f32 -1.442695, %v1275_v62 }
 0x840   :  { %2553 = vpow2.f32 %v1293_v63 }
 0x84a   :  { %v2554_v1 = vpop.eup %2553 }
 0x84b   :  { %v1279_v2 = vadd.f32 1.0, %v2554_v1 }
 0x84d   :  { %2555 = vrcp.f32 %v1279_v2 }
 0x857   :  { %v2556_v3 = vpop.eup %2555 }
 0x858   :  { %1282 = vst [vmem:[%s3104_s6] sm:$0xff] %v2556_v3 }

</bundles_post_ra>
